<compile_context>
chip_gen: v7x
topology: tpu7x:2x2x1
jax: 0.10.0
libtpu: 0.0.40
codegen_flags: <defaults>
</compile_context>

<pallas_src>
import math

import jax
import jax.numpy as jnp
from jax.experimental import pallas as pl
from jax.experimental.pallas import tpu as pltpu


def _mlp_kernel(x_ref, w1_ref, w2_ref, o_ref):
    """One grid step = one tile of block_m rows.

    x_ref  : VMEM (tm, C)  bf16
    w1_ref : VMEM (C, H)   bf16 (resident: constant index_map)
    w2_ref : VMEM (H, O)   bf16 (resident: constant index_map)
    o_ref  : VMEM (tm, O)  out dtype
    """
    # fc1 (no bias): bf16 x bf16 -> f32 accumulate on the MXU
    h = jnp.dot(x_ref[...], w1_ref[...], preferred_element_type=jnp.float32)

    # GELU(approximate='tanh') in f32 (tanh goes to the EUP slot)
    c = jnp.float32(math.sqrt(2.0 / math.pi))
    h = 0.5 * h * (1.0 + jnp.tanh(c * (h + 0.044715 * (h * h * h))))

    # fc2 (no bias): cast activations back to bf16 for the MXU, f32 accumulate
    y = jnp.dot(h.astype(w2_ref.dtype), w2_ref[...],
                preferred_element_type=jnp.float32)

    o_ref[...] = y.astype(o_ref.dtype)


def mlp_forward(x, w1, w2, *, block_m=256):
    """x: (..., C); w1: (C, H); w2: (H, O). Returns (..., O) in x.dtype."""
    orig_shape = x.shape
    C = orig_shape[-1]
    H = w1.shape[1]
    O = w2.shape[1]
    M = 1
    for d in orig_shape[:-1]:
        M *= d
    out_dtype = x.dtype

    # bf16 MXU operands, f32 accumulation inside the kernel.
    x2 = x.reshape(M, C).astype(jnp.bfloat16)
    w1b = w1.astype(jnp.bfloat16)
    w2b = w2.astype(jnp.bfloat16)

    if M <= block_m:
        # Single full-extent block (exempt from the (8,128)/(16,128) rule).
        tm = M
        m_pad = M
    else:
        tm = block_m                       # multiple of 16: bf16 sublane tiling ok
        m_pad = pl.cdiv(M, tm) * tm
        if m_pad != M:
            x2 = jnp.pad(x2, ((0, m_pad - M), (0, 0)))
    grid = (m_pad // tm,)

    cost = pl.CostEstimate(
        flops=2 * m_pad * (C * H + H * O),
        transcendentals=m_pad * H,
        bytes_accessed=(x2.size + w1b.size + w2b.size) * 2
                       + m_pad * O * jnp.dtype(out_dtype).itemsize,
    )

    out = pl.pallas_call(
        _mlp_kernel,
        out_shape=jax.ShapeDtypeStruct((m_pad, O), out_dtype),
        grid_spec=pltpu.PrefetchScalarGridSpec(
            num_scalar_prefetch=0,
            grid=grid,
            in_specs=[
                pl.BlockSpec((tm, C), lambda i: (i, 0)),   # x tile (streams over M)
                pl.BlockSpec((C, H), lambda i: (0, 0)),    # w1 (resident)
                pl.BlockSpec((H, O), lambda i: (0, 0)),    # w2 (resident)
            ],
            out_specs=pl.BlockSpec((tm, O), lambda i: (i, 0)),
        ),
        compiler_params=pltpu.CompilerParams(
            dimension_semantics=("parallel",),             # M tiles are independent
            vmem_limit_bytes=64 * 1024 * 1024,
        ),
        cost_estimate=cost,
    )(x2, w1b, w2b)

    if m_pad != M:
        out = out[:M]
    return out.reshape(*orig_shape[:-1], O)


class MLPJAX:
    """JAX/Pallas port of the PyTorch MLP (fc1 -> GELU(tanh) -> fc2, no biases)."""

    def __init__(self, in_features, hidden_features, out_features, key=None):
        out_features = out_features or in_features
        hidden_features = hidden_features or in_features
        if key is None:
            key = jax.random.PRNGKey(0)
        k1, k2 = jax.random.split(key)
        # nn.Linear(in, hidden, bias=False).weight is (hidden, in); we store the
        # transpose (in, hidden) so the kernel computes x @ W.
        b1 = 1.0 / math.sqrt(in_features)
        b2 = 1.0 / math.sqrt(hidden_features)
        self.w1 = jax.random.uniform(k1, (in_features, hidden_features),
                                     jnp.float32, -b1, b1)
        self.w2 = jax.random.uniform(k2, (hidden_features, out_features),
                                     jnp.float32, -b2, b2)

    def __call__(self, x):
        return mlp_forward(x, self.w1, self.w2)


def _reference(x, w1, w2):
    """Pure-JAX f32 reference matching the PyTorch module."""
    h = x.astype(jnp.float32) @ w1.astype(jnp.float32)
    c = math.sqrt(2.0 / math.pi)
    h = 0.5 * h * (1.0 + jnp.tanh(c * (h + 0.044715 * h ** 3)))
    return h @ w2.astype(jnp.float32)


if __name__ == "__main__":
    B, T, C, H = 2, 8, 16, 32
    key = jax.random.PRNGKey(0)
    k_x, k_x2, k_mod = jax.random.split(key, 3)

    mlp = MLPJAX(in_features=C, hidden_features=H, out_features=C, key=k_mod)

    # Small-shape check: single full block (grid of 1).
    x = jax.random.normal(k_x, (B, T, C), jnp.float32)
    out = jax.block_until_ready(mlp(x))
    ref = _reference(x, mlp.w1, mlp.w2)
    assert out.shape == (B, T, C)
    # bf16 MXU operands -> relaxed tolerance vs the f32 reference.
    assert jnp.allclose(out, ref, atol=3e-2, rtol=3e-2), "mismatch vs reference (small)"

    # Larger-M check: exercises the tiled (padded) M path, grid > 1.
    x_big = jax.random.normal(k_x2, (4, 300, C), jnp.float32)
    out_big = jax.block_until_ready(mlp(x_big))
    ref_big = _reference(x_big, mlp.w1, mlp.w2)
    assert out_big.shape == (4, 300, C)
    assert jnp.allclose(out_big, ref_big, atol=3e-2, rtol=3e-2), "mismatch vs reference (tiled)"

    print("KERNEL_OK")
</pallas_src>

<mosaic_0001>
module attributes {stable_mosaic.version = 11 : i64} {
  func.func @_mlp_kernel(%arg0: i32, %arg1: memref<16x16xbf16, #tpu.memory_space<vmem>>, %arg2: memref<16x32xbf16, #tpu.memory_space<vmem>>, %arg3: memref<32x16xbf16, #tpu.memory_space<vmem>>, %arg4: memref<16x16xf32, #tpu.memory_space<vmem>>) attributes {dimension_semantics = [#tpu.dimension_semantics<parallel>], iteration_bounds = array<i64: 1>, scalar_prefetch = 0 : i64, scratch_operands = 0 : i64, tpu.core_type = #tpu.core_type<tc>, window_params = [{transform_indices = @transform_0, window_bounds = array<i64: 16, 16>}, {pipeline_mode = #tpu.pipeline_mode<synchronous>, transform_indices = @transform_1, window_bounds = array<i64: 16, 32>}, {pipeline_mode = #tpu.pipeline_mode<synchronous>, transform_indices = @transform_2, window_bounds = array<i64: 32, 16>}, {transform_indices = @transform_3, window_bounds = array<i64: 16, 16>}]} {
    %c0 = arith.constant 0 : index
    %c0_0 = arith.constant 0 : index
    %0 = vector.load %arg1[%c0, %c0_0] : memref<16x16xbf16, #tpu.memory_space<vmem>>, vector<16x16xbf16>
    %c0_1 = arith.constant 0 : index
    %c0_2 = arith.constant 0 : index
    %1 = vector.load %arg2[%c0_1, %c0_2] : memref<16x32xbf16, #tpu.memory_space<vmem>>, vector<16x32xbf16>
    %cst = arith.constant dense<0.000000e+00> : vector<16x32xf32>
    %2 = tpu.matmul %0, %1, %cst {dimension_numbers = #tpu.dot_dimension_numbers<[1], [0], [0], [1], [0, 0, 1, 1], [], []>} : vector<16x16xbf16>, vector<16x32xbf16>, vector<16x32xf32> -> vector<16x32xf32>
    %cst_3 = arith.constant 5.000000e-01 : f32
    %3 = vector.broadcast %cst_3 : f32 to vector<16x32xf32>
    %4 = arith.mulf %3, %2 : vector<16x32xf32>
    %5 = arith.mulf %2, %2 : vector<16x32xf32>
    %6 = arith.mulf %5, %2 : vector<16x32xf32>
    %cst_4 = arith.constant 4.471500e-02 : f32
    %7 = vector.broadcast %cst_4 : f32 to vector<16x32xf32>
    %8 = arith.mulf %7, %6 : vector<16x32xf32>
    %9 = arith.addf %2, %8 : vector<16x32xf32>
    %cst_5 = arith.constant 0.797884583 : f32
    %10 = vector.broadcast %cst_5 : f32 to vector<16x32xf32>
    %11 = arith.mulf %10, %9 : vector<16x32xf32>
    %12 = math.tanh %11 : vector<16x32xf32>
    %cst_6 = arith.constant 1.000000e+00 : f32
    %13 = vector.broadcast %cst_6 : f32 to vector<16x32xf32>
    %14 = arith.addf %13, %12 : vector<16x32xf32>
    %15 = arith.mulf %4, %14 : vector<16x32xf32>
    %16 = arith.truncf %15 : vector<16x32xf32> to vector<16x32xbf16>
    %c0_7 = arith.constant 0 : index
    %c0_8 = arith.constant 0 : index
    %17 = vector.load %arg3[%c0_7, %c0_8] : memref<32x16xbf16, #tpu.memory_space<vmem>>, vector<32x16xbf16>
    %cst_9 = arith.constant dense<0.000000e+00> : vector<16x16xf32>
    %18 = tpu.matmul %16, %17, %cst_9 {dimension_numbers = #tpu.dot_dimension_numbers<[1], [0], [0], [1], [0, 0, 1, 1], [], []>} : vector<16x32xbf16>, vector<32x16xbf16>, vector<16x16xf32> -> vector<16x16xf32>
    %c0_10 = arith.constant 0 : index
    %c0_11 = arith.constant 0 : index
    %19 = vector.load %arg4[%c0_10, %c0_11] : memref<16x16xf32, #tpu.memory_space<vmem>>, vector<16x16xf32>
    tpu.vector_store %arg4[%c0_10, %c0_11], %18 {strides = array<i32>} : memref<16x16xf32, #tpu.memory_space<vmem>>, vector<16x16xf32>,
    return
  }
  func.func @transform_0(%arg0: i32) -> (i32, i32) {
    %c0_i32 = arith.constant 0 : i32
    %c0_i32_0 = arith.constant 0 : i32
    return %arg0, %c0_i32 : i32, i32
  }
  func.func @transform_1(%arg0: i32) -> (i32, i32) {
    %c0_i32 = arith.constant 0 : i32
    %c0_i32_0 = arith.constant 0 : i32
    %c0_i32_1 = arith.constant 0 : i32
    return %c0_i32, %c0_i32_0 : i32, i32
  }
  func.func @transform_2(%arg0: i32) -> (i32, i32) {
    %c0_i32 = arith.constant 0 : i32
    %c0_i32_0 = arith.constant 0 : i32
    %c0_i32_1 = arith.constant 0 : i32
    return %c0_i32, %c0_i32_0 : i32, i32
  }
  func.func @transform_3(%arg0: i32) -> (i32, i32) {
    %c0_i32 = arith.constant 0 : i32
    %c0_i32_0 = arith.constant 0 : i32
    return %arg0, %c0_i32 : i32, i32
  }
}

</mosaic_0001>

<bundles_post_ra>
// kernel: tpu_custom_call.1
= control target key start
LH: loop header
LB: loop body
LE: loop exit
PB: predicated region body
PF: predicated region fallthrough
CT: control target
= control target key end

     0   :  { %8 = vsyncpa [#allocation3], 0  ;;  %s451_s0 = inlined_call_operand.hbm [shape: bf16[16,16], index: 0, kind: input, shape index: {}]   ;;  %s452_s1 = inlined_call_operand.hbm [shape: bf16[16,32], index: 1, kind: input, shape index: {}]   ;;  %s453_s2 = inlined_call_operand.hbm [shape: bf16[32,16], index: 2, kind: input, shape index: {}]   ;;  %s454_s3 = inlined_call_operand.hbm [shape: f32[16,16], index: 3, kind: output, shape index: {}]  }
   0x1   :  { %9 = vsyncpa [#allocation6], 0 }
   0x2   :  { %10 = vsyncpa [#allocation4], 0  ;;  %s354_s12 = smov [#allocation5]   ;;  %s355_s14 = smov [#allocation2]  }
   0x3   :  { %s28_s13 = sshll.u32 %s354_s12, 4  ;;  %s16_s15 = sshll.u32 %s355_s14, 4  ;;  %s29_s13 = int_to_ptr.vmem [resolvable:$true] %s28_s13  ;;  %s384_s15 = int_to_ptr.vmem [resolvable:$true] %s16_s15 }
   0x4   :  { %s260_s18 = scalar_lea.hbm %s452_s1, 128 }
   0x5   :  { %p261_p0 = scmp.ne.s32.totalorder %s452_s1, %s260_s18  ;;  %p264_p1 = scmp.lt.u32.totalorder %s260_s18, %s452_s1 }
   0x7   :  { %p266_p2 = pnand %p264_p1, %p261_p0 }
   0x9   :  { %269 = shalt.err (!%p266_p2)
}
   0xa   :  { %s270_s23 = scalar_lea.vmem %s29_s13, 128  ;;  %p275_p4 = scmp.lt.s32.totalorder %s29_s13, %s29_s13 }
   0xb   :  { %p271_p3 = scmp.ne.s32.totalorder %s29_s13, %s270_s23  ;;  %p276_p5 = scmp.lt.s32.totalorder %s270_s23, %s270_s23 }
   0xd   :  { %p277_p6 = por %p276_p5, %p275_p4 }
   0xf   :  { %p278_p7 = pnand %p277_p6, %p271_p3 }
  0x11   :  { %281 = shalt.err (!%p278_p7)
}
  0x12   :  { %s356_s24 = smov 64   ;;  %s357_s25 = smov 4  }
  0x13   :  { %34 = dma.hbm_to_vmem [thread:$0]  %s452_s1, 128, %s29_s13, [#allocation6], %s356_s24, %s356_s24, %s357_s25  }
  0x14   :  { %s282_s30 = scalar_lea.hbm %s451_s0, 128 }
  0x15   :  { %p283_p8 = scmp.ne.s32.totalorder %s451_s0, %s282_s30  ;;  %p286_p9 = scmp.lt.u32.totalorder %s282_s30, %s451_s0 }
  0x17   :  { %p288_p10 = pnand %p286_p9, %p283_p8 }
  0x19   :  { %291 = shalt.err (!%p288_p10)
}
  0x1a   :  { %s292_s8 = scalar_lea.vmem %s384_s15, 128  ;;  %p297_p12 = scmp.lt.s32.totalorder %s384_s15, %s384_s15 }
  0x1b   :  { %p293_p11 = scmp.ne.s32.totalorder %s384_s15, %s292_s8  ;;  %p298_p13 = scmp.lt.s32.totalorder %s292_s8, %s292_s8 }
  0x1d   :  { %p299_p0 = por %p298_p13, %p297_p12 }
  0x1f   :  { %p300_p1 = pnand %p299_p0, %p293_p11 }
  0x21   :  { %303 = shalt.err (!%p300_p1)
}
  0x22   :  { %22 = dma.hbm_to_vmem [thread:$0]  %s451_s0, 128, %s384_s15, [#allocation3], %s356_s24, %s356_s24, %s357_s25  }
  0x23   :  { %s358_s10 = smov [#allocation7]   ;;  %s304_s14 = scalar_lea.hbm %s453_s2, 256 }
  0x24   :  { %s40_s11 = sshll.u32 %s358_s10, 4  ;;  %p305_p2 = scmp.ne.s32.totalorder %s453_s2, %s304_s14  ;;  %s41_s11 = int_to_ptr.vmem [resolvable:$true] %s40_s11 }
  0x25   :  { %p308_p3 = scmp.lt.u32.totalorder %s304_s14, %s453_s2 }
  0x27   :  { %p310_p4 = pnand %p308_p3, %p305_p2 }
  0x29   :  { %313 = shalt.err (!%p310_p4)
}
  0x2a   :  { %s314_s20 = scalar_lea.vmem %s41_s11, 256  ;;  %p319_p6 = scmp.lt.s32.totalorder %s41_s11, %s41_s11 }
  0x2b   :  { %p315_p5 = scmp.ne.s32.totalorder %s41_s11, %s314_s20  ;;  %p320_p7 = scmp.lt.s32.totalorder %s314_s20, %s314_s20 }
  0x2d   :  { %p321_p8 = por %p320_p7, %p319_p6 }
  0x2f   :  { %p322_p9 = pnand %p321_p8, %p315_p5 }
  0x31   :  { %325 = shalt.err (!%p322_p9)
}
  0x32   :  { %46 = dma.hbm_to_vmem [thread:$0]  %s453_s2, 256, %s41_s11, [#allocation6], %s356_s24, %s356_s24, %s357_s25  }
  0x33   :  { %348 = dma.done.wait [#allocation3], 128  }
  0x34   :  { %349 = vsyncadd [#allocation3], 4294967168 }
  0x35   :  { %350 = dma.done.wait [#allocation6], 384  }
  0x36   :  { %351 = vsyncadd [#allocation6], 4294966912  ;;  %v359_v0 = vmov 0.0   ;;  %vm360_vm0 = vmmov 0   ;;  %v252_v1 = vld [vmem:[#allocation5] sm:$0xff]   ;;  %v253_v2 = vld [vmem:[#allocation2] sm:$0xff]  }
  0x37   :  { %228 = vmatprep.subr.bf16.mxu0 %v359_v0  ;;  %230 = vmatprep.mubr.msk.bf16.mxu0 %vm360_vm0, %v359_v0  ;;  %vm72_vm1 = vcmask 130048   ;;  %v254_v3 = vld [vmem:[#allocation7] sm:$0xff]   ;;  %v255_v4 = vld [vmem:[#allocation7 + $0x8] sm:$0xff]   ;;  %vm152_vm2 = vcmask 261120   ;;  %s361_s2 = smov [#allocation8]  }
  0x38   :  { %234 = vmatprep.subr.bf16.mxu1 %v359_v0  ;;  %238 = vmatprep.mubr.msk.bf16.mxu1 %vm360_vm0, %v359_v0  ;;  %s204_s21 = sshll.u32 %s361_s2, 4  ;;  %s205_s21 = int_to_ptr.vmem [resolvable:$true] %s204_s21 }
  0x39   :  { %229 = vmatpush3.bf16.msra.mxu0 %v252_v1  ;;  %235 = vmatpush3.bf16.msra.mxu1 %v254_v3  ;;  %s326_s22 = scalar_lea.vmem %s205_s21, 256  ;;  %p331_p11 = scmp.lt.s32.totalorder %s205_s21, %s205_s21 }
  0x3a   :  { %236 = vmatprep.subr.bf16.mxu1 %v359_v0  ;;  %p327_p10 = scmp.ne.s32.totalorder %s205_s21, %s326_s22  ;;  %p332_p12 = scmp.lt.s32.totalorder %s326_s22, %s326_s22 }
  0x3c   :  { %231 = vmatmul.mubr.msk.bf16.vlgmr.msra.gmra.mrb[0].mxu0 %vm72_vm1, %v253_v2  ;;  %p333_p13 = por %p332_p12, %p331_p11 }
  0x3d   :  { %237 = vmatpush3.bf16.msra.mxu1 %v255_v4 }
  0x3e   :  { %p334_p0 = pnand %p333_p13, %p327_p10 }
 0x10f   :  { %v110_v5 = vpop.f32.mrb[0].mxu0 }
 0x110   :  { %v119_v6 = vmul.f32 %v110_v5, %v110_v5  ;;  %v232_v7 = vpop.f32.mrb[1].mxu0  ;;  %v117_v22 = vmul.f32 0.5, %v110_v5 }
 0x111   :  { %v113_v8 = vpop.f32.mrb[2].mxu0 }
 0x112   :  { %v121_v9 = vmul.f32 %v119_v6, %v110_v5  ;;  %v120_v10 = vmul.f32 %v113_v8, %v113_v8  ;;  %v233_v11 = vpop.f32.mrb[3].mxu0  ;;  %v118_v23 = vmul.f32 0.5, %v113_v8 }
 0x114   :  { %v123_v12 = vmul.f32 0.044715, %v121_v9  ;;  %v122_v13 = vmul.f32 %v120_v10, %v113_v8 }
 0x116   :  { %v125_v14 = vadd.f32 %v123_v12, %v110_v5  ;;  %v124_v15 = vmul.f32 0.044715, %v122_v13 }
 0x118   :  { %v127_v16 = vmul.f32 0.7978846, %v125_v14  ;;  %v126_v17 = vadd.f32 %v124_v15, %v113_v8 }
 0x11a   :  { %256 = vtanh.f32 %v127_v16  ;;  %v128_v18 = vmul.f32 0.7978846, %v126_v17 }
 0x11c   :  { %258 = vtanh.f32 %v128_v18 }
 0x124   :  { %v257_v19 = vpop.eup %256 }
 0x125   :  { %v131_v20 = vadd.f32 1.0, %v257_v19 }
 0x126   :  { %v259_v21 = vpop.eup %258 }
 0x127   :  { %v132_v24 = vadd.f32 1.0, %v259_v21  ;;  %v133_v25 = vmul.f32 %v131_v20, %v117_v22 }
 0x129   :  { %v134_v26 = vmul.f32 %v132_v24, %v118_v23 }
 0x12b   :  { %v135_v27 = vpack.c.bf16 %v134_v26, %v133_v25 }
 0x12d   :  { %239 = vmatmul.mubr.msk.bf16.vlgmr.msra.gmra.mrb[0].mxu1 %vm152_vm2, %v135_v27 }
 0x200   :  { %v190_v28 = vpop.f32.mrb[0].mxu1 }
 0x201   :  { %197 = vst.msk [vmem:[#allocation8] sm:$0xff] %vm72_vm1, %v190_v28  ;;  %v240_v29 = vpop.f32.mrb[1].mxu1 }
 0x202   :  { %v193_v30 = vpop.f32.mrb[2].mxu1 }
 0x203   :  { %198 = vst.msk [vmem:[#allocation8 + $0x8] sm:$0xff] %vm72_vm1, %v193_v30  ;;  %v241_v31 = vpop.f32.mrb[3].mxu1 }
 0x204   :  { %337 = shalt.err (!%p334_p0)
}
 0x205   :  { %s338_s25 = scalar_lea.hbm %s454_s3, 256 }
 0x206   :  { %p339_p1 = scmp.ne.s32.totalorder %s454_s3, %s338_s25  ;;  %p342_p2 = scmp.lt.u32.totalorder %s338_s25, %s454_s3 }
 0x208   :  { %p344_p3 = pnand %p342_p2, %p339_p1 }
 0x20a   :  { %347 = shalt.err (!%p344_p3)
}
 0x20b   :  { %s362_s30 = smov 128   ;;  %s363_s4 = smov 8  }
 0x20c   :  { %210 = dma.vmem_to_hbm [thread:$0]  %s205_s21, 256, %s454_s3, [#allocation4], %s362_s30, %s362_s30, %s363_s4  }
 0x20d   :  { %352 = dma.done.wait [#allocation4], 256  }
 0x20e   :  { %353 = vsyncadd [#allocation4], 4294967040 }
 0x20f   :  { %214 = vsyncpa [#allocation3], 1 }
 0x210   :  { %215 = vsyncpa [#allocation6], 1 }
 0x211   :  { %216 = vsyncpa [#allocation4], 1 }

</bundles_post_ra>
